<compile_context>
chip_gen: v6e
topology: v6e:2x2x1
jax: 0.10.0
libtpu: 0.0.40
codegen_flags: <defaults>
</compile_context>

<pallas_src>
import functools

import jax
import jax.numpy as jnp
import numpy as np
from jax import lax
from jax.experimental import pallas as pl
from jax.experimental.pallas import tpu as pltpu
from jax.scipy.special import erf as _jax_erf

_INV_SQRT2 = 0.7071067811865476


def _erf(z):
    """Abramowitz & Stegun 7.1.26 erf (|abs err| <= 1.5e-7).

    exp lives on the EUP; the 1/(1+p|z|) uses the approx EUP reciprocal so the
    VALU (second-most loaded slot after the MXU here) stays free.
    """
    a1, a2, a3, a4, a5 = (0.254829592, -0.284496736, 1.421413741,
                          -1.453152027, 1.061405429)
    p = 0.3275911
    sign = jnp.where(z < 0.0, -1.0, 1.0)
    x = jnp.abs(z)
    t = pl.reciprocal(1.0 + p * x, approx=True)
    poly = ((((a5 * t + a4) * t + a3) * t + a2) * t + a1) * t
    return sign * (1.0 - poly * jnp.exp(-x * x))


def _gelu_exact(x):
    return 0.5 * x * (1.0 + _erf(x * _INV_SQRT2))


def _geglu_kernel(x_ref, w0_ref, b0_ref, w1_ref, b1_ref, w2_ref, b2_ref,
                  o_ref, *, eps, n_chunks):
    cdt = w0_ref.dtype                       # MXU operand dtype (bf16)
    tm, D = x_ref.shape

    # ---- LayerNorm (gamma/beta pre-folded into w0/w1/b0/b1 in the wrapper).
    # One-pass statistics: var = E[x^2] - E[x]^2 -> single XLU reduction pass.
    x = x_ref[...].astype(jnp.float32)
    mean = jnp.mean(x, axis=-1, keepdims=True)
    msq = jnp.mean(x * x, axis=-1, keepdims=True)
    var = jnp.maximum(msq - mean * mean, 0.0)
    xn = ((x - mean) * lax.rsqrt(var + eps)).astype(cdt)   # bf16 MXU LHS

    # ---- Gated MLP, H chunked so only (tm, hc) temporaries are live.
    def chunk(c, acc):
        w0c = w0_ref[c]                      # (D, hc)  bf16
        w1c = w1_ref[c]                      # (D, hc)  bf16
        w2c = w2_ref[c]                      # (hc, D)  bf16
        h0 = jnp.dot(xn, w0c, preferred_element_type=jnp.float32) + b0_ref[c]
        h1 = jnp.dot(xn, w1c, preferred_element_type=jnp.float32) + b1_ref[c]
        h = (_gelu_exact(h0) * h1).astype(cdt)             # bf16 MXU LHS
        return acc + jnp.dot(h, w2c, preferred_element_type=jnp.float32)

    acc = lax.fori_loop(0, n_chunks, chunk,
                        jnp.zeros((tm, D), jnp.float32),
                        unroll=bool(n_chunks <= 8))
    o_ref[...] = (acc + b2_ref[...]).astype(o_ref.dtype)


def geglu_mlp(x, ln_w, ln_b, w0, b0, w1, b1, w2, b2, *, eps=1e-6,
              block_rows=256, compute_dtype=jnp.bfloat16):
    """GeGluMlp forward.

    x: (..., D). Weights in PyTorch nn.Linear layout: w0/w1: (H, D), w2: (D, H),
    biases 1-D; LayerNorm affine ln_w/ln_b: (D,). Returns same shape as x.
    block_rows: 256 is good for v6e/v7x (2x256 MXU); 128 saturates v5e.
    """
    orig_shape = x.shape
    D = int(orig_shape[-1])
    H = int(w0.shape[0])
    M = int(np.prod(orig_shape[:-1]))
    x2d = x.reshape(M, D)                    # merges leading dims only (free)

    # Row-tile size: multiple of 8 sublanes. The ragged last tile is handled by
    # Pallas' masked stores -> no jnp.pad / [:M] slice HBM round-trips.
    tm = max(8, (int(block_rows) // 8) * 8)
    tm = min(tm, ((M + 7) // 8) * 8)
    grid_rows = pl.cdiv(M, tm)

    # Hidden-dim chunk size (keeps (tm, hc) temporaries small & VMEM-friendly).
    if H % 512 == 0:
        hc = 512
    elif H % 256 == 0:
        hc = 256
    elif H % 128 == 0:
        hc = 128
    else:
        hc = H
    nc = H // hc

    f32 = jnp.float32
    gamma = ln_w.astype(f32)
    beta = ln_b.astype(f32)
    w0_t = jnp.transpose(w0).astype(f32)     # (D, H)
    w1_t = jnp.transpose(w1).astype(f32)     # (D, H)
    w2_t = jnp.transpose(w2).astype(f32)     # (H, D)

    # Fold LayerNorm affine into the hidden projections (free at trace time):
    #   (xhat*gamma + beta) @ W = xhat @ (gamma[:,None]*W) + beta @ W
    w0_f = gamma[:, None] * w0_t
    w1_f = gamma[:, None] * w1_t
    b0_f = b0.astype(f32) + beta @ w0_t
    b1_f = b1.astype(f32) + beta @ w1_t

    # Chunked, MXU-ready (bf16) weight layouts; biases stay f32 (added to the
    # f32 accumulators).
    w0_c = w0_f.reshape(D, nc, hc).transpose(1, 0, 2).astype(compute_dtype)  # (nc,D,hc)
    w1_c = w1_f.reshape(D, nc, hc).transpose(1, 0, 2).astype(compute_dtype)  # (nc,D,hc)
    w2_c = w2_t.reshape(nc, hc, D).astype(compute_dtype)                     # (nc,hc,D)
    b0_c = b0_f.reshape(nc, 1, hc)
    b1_c = b1_f.reshape(nc, 1, hc)
    b2_2 = b2.astype(f32).reshape(1, D)

    itemsize = x.dtype.itemsize
    csize = np.dtype(compute_dtype).itemsize

    # Generation-aware VMEM budget (v5e/v6e: 128 MiB, v7x: 64 MiB per core).
    try:
        vmem_cap = int(pltpu.get_tpu_info().vmem_capacity_bytes)
    except Exception:
        vmem_cap = 128 * 1024 * 1024
    weight_bytes = 3 * D * H * csize + (2 * H + D) * 4
    io_bytes = 2 * 2 * tm * D * itemsize                  # double-buffered x/out tiles
    work_bytes = tm * D * (csize + 4) + 4 * tm * hc * 4   # xn + acc + chunk temps
    vmem_limit = int(min(int(vmem_cap * 0.8),
                         max(32 * 1024 * 1024,
                             2 * (weight_bytes + io_bytes + work_bytes))))
    # TODO(synk): if bf16 weights (3*D*H*2 B) exceed the per-core VMEM budget
    # (mainly v7x), add a second "arbitrary" grid axis streaming H-chunks of the
    # weights with a (tm, D) VMEM accumulator instead of resident weights.

    m_eff = grid_rows * tm
    cost = pl.CostEstimate(
        flops=6 * m_eff * D * H + 12 * m_eff * D + 10 * m_eff * H,
        transcendentals=m_eff * (2 * H + 1),   # exp + approx-recip per hidden, rsqrt per row
        bytes_accessed=2 * M * D * itemsize + weight_bytes,
    )

    row_spec = pl.BlockSpec((tm, D), lambda i: (i, 0))
    kernel = functools.partial(_geglu_kernel, eps=eps, n_chunks=nc)

    def run(single_buffer_weights):
        def const(shape):
            idx = lambda i, _s=shape: (0,) * len(_s)
            if single_buffer_weights:
                # Fetched once (constant index_map) -> double-buffering them is
                # pure VMEM waste; request a single buffer.
                return pl.BlockSpec(shape, idx, pipeline_mode=pl.Buffered(1))
            return pl.BlockSpec(shape, idx)

        return pl.pallas_call(
            kernel,
            out_shape=jax.ShapeDtypeStruct((M, D), x.dtype),
            grid=(grid_rows,),
            in_specs=[
                row_spec,                   # x row tiles (pipelined)
                const((nc, D, hc)),         # w0 (gamma folded, bf16, resident)
                const((nc, 1, hc)),         # b0 (beta folded, f32)
                const((nc, D, hc)),         # w1
                const((nc, 1, hc)),         # b1
                const((nc, hc, D)),         # w2
                const((1, D)),              # b2
            ],
            out_specs=row_spec,
            compiler_params=pltpu.CompilerParams(
                dimension_semantics=("parallel",),
                vmem_limit_bytes=vmem_limit,
            ),
            cost_estimate=cost,
        )(x2d, w0_c, b0_c, w1_c, b1_c, w2_c, b2_2)

    try:
        out2d = run(single_buffer_weights=True)
    except Exception:
        # Fallback if this Pallas build rejects Buffered(1) on resident blocks.
        out2d = run(single_buffer_weights=False)

    return out2d.reshape(orig_shape)


def _reference(x, ln_w, ln_b, w0, b0, w1, b1, w2, b2, eps=1e-6):
    """Pure-JAX f32 reference matching the PyTorch module."""
    xf = x.astype(jnp.float32)
    mu = jnp.mean(xf, axis=-1, keepdims=True)
    var = jnp.mean((xf - mu) ** 2, axis=-1, keepdims=True)
    xn = (xf - mu) * lax.rsqrt(var + eps) * ln_w + ln_b
    hp = lax.Precision.HIGHEST
    h0 = jnp.dot(xn, w0.T, precision=hp) + b0
    h1 = jnp.dot(xn, w1.T, precision=hp) + b1
    g = 0.5 * h0 * (1.0 + _jax_erf(h0 * _INV_SQRT2))
    return jnp.dot(g * h1, w2.T, precision=hp) + b2


if __name__ == "__main__":
    key = jax.random.PRNGKey(0)
    ks = jax.random.split(key, 9)

    # Small shapes: batch=2, seq=16, in_features=32, hidden_features=64.
    # block_rows=8 -> 4-step pipelined row grid gets exercised.
    B, T, D, H = 2, 16, 32, 64
    x = jax.random.normal(ks[0], (B, T, D), dtype=jnp.float32)
    ln_w = 1.0 + 0.1 * jax.random.normal(ks[1], (D,), dtype=jnp.float32)
    ln_b = 0.1 * jax.random.normal(ks[2], (D,), dtype=jnp.float32)
    w0 = jax.random.normal(ks[3], (H, D), dtype=jnp.float32) / np.sqrt(D)
    b0 = 0.1 * jax.random.normal(ks[4], (H,), dtype=jnp.float32)
    w1 = jax.random.normal(ks[5], (H, D), dtype=jnp.float32) / np.sqrt(D)
    b1 = 0.1 * jax.random.normal(ks[6], (H,), dtype=jnp.float32)
    w2 = jax.random.normal(ks[7], (D, H), dtype=jnp.float32) / np.sqrt(H)
    b2 = 0.1 * jax.random.normal(ks[8], (D,), dtype=jnp.float32)

    out = geglu_mlp(x, ln_w, ln_b, w0, b0, w1, b1, w2, b2, block_rows=8)
    out = jax.block_until_ready(out)

    ref = _reference(x, ln_w, ln_b, w0, b0, w1, b1, w2, b2)
    assert out.shape == ref.shape == (B, T, D), (out.shape, ref.shape)
    # Tolerance accounts for bf16 MXU operands (f32 accumulation) vs the full-f32
    # reference plus the approx-reciprocal in the erf polynomial.
    np.testing.assert_allclose(np.asarray(out), np.asarray(ref),
                               rtol=3e-2, atol=3e-2)

    print("KERNEL_OK")
</pallas_src>

<mosaic_0001>
module attributes {stable_mosaic.version = 11 : i64} {
  func.func @_geglu_kernel(%arg0: i32, %arg1: memref<8x32xf32, #tpu.memory_space<vmem>>, %arg2: memref<1x32x64xbf16, #tpu.memory_space<vmem>>, %arg3: memref<1x1x64xf32, #tpu.memory_space<vmem>>, %arg4: memref<1x32x64xbf16, #tpu.memory_space<vmem>>, %arg5: memref<1x1x64xf32, #tpu.memory_space<vmem>>, %arg6: memref<1x64x32xbf16, #tpu.memory_space<vmem>>, %arg7: memref<1x32xf32, #tpu.memory_space<vmem>>, %arg8: memref<8x32xf32, #tpu.memory_space<vmem>>) attributes {dimension_semantics = [#tpu.dimension_semantics<parallel>], iteration_bounds = array<i64: 4>, scalar_prefetch = 0 : i64, scratch_operands = 0 : i64, tpu.core_type = #tpu.core_type<tc>, window_params = [{transform_indices = @transform_0, window_bounds = array<i64: 8, 32>}, {pipeline_mode = #tpu.pipeline_mode<synchronous>, transform_indices = @transform_1, window_bounds = array<i64: 1, 32, 64>}, {pipeline_mode = #tpu.pipeline_mode<synchronous>, transform_indices = @transform_2, window_bounds = array<i64: 1, 1, 64>}, {pipeline_mode = #tpu.pipeline_mode<synchronous>, transform_indices = @transform_3, window_bounds = array<i64: 1, 32, 64>}, {pipeline_mode = #tpu.pipeline_mode<synchronous>, transform_indices = @transform_4, window_bounds = array<i64: 1, 1, 64>}, {pipeline_mode = #tpu.pipeline_mode<synchronous>, transform_indices = @transform_5, window_bounds = array<i64: 1, 64, 32>}, {pipeline_mode = #tpu.pipeline_mode<synchronous>, transform_indices = @transform_6, window_bounds = array<i64: 1, 32>}, {transform_indices = @transform_7, window_bounds = array<i64: 8, 32>}]} {
    %c0 = arith.constant 0 : index
    %c0_0 = arith.constant 0 : index
    %0 = vector.load %arg1[%c0, %c0_0] : memref<8x32xf32, #tpu.memory_space<vmem>>, vector<8x32xf32>
    %cst = arith.constant dense<0.000000e+00> : vector<8xf32>
    %1 = vector.multi_reduction <add>, %0, %cst [1] : vector<8x32xf32> to vector<8xf32>
    %2 = vector.shape_cast %1 : vector<8xf32> to vector<8x1xf32>
    %cst_1 = arith.constant 3.200000e+01 : f32
    %3 = vector.broadcast %cst_1 : f32 to vector<8x1xf32>
    %4 = arith.divf %2, %3 : vector<8x1xf32>
    %5 = arith.mulf %0, %0 : vector<8x32xf32>
    %cst_2 = arith.constant dense<0.000000e+00> : vector<8xf32>
    %6 = vector.multi_reduction <add>, %5, %cst_2 [1] : vector<8x32xf32> to vector<8xf32>
    %7 = vector.shape_cast %6 : vector<8xf32> to vector<8x1xf32>
    %cst_3 = arith.constant 3.200000e+01 : f32
    %8 = vector.broadcast %cst_3 : f32 to vector<8x1xf32>
    %9 = arith.divf %7, %8 : vector<8x1xf32>
    %10 = arith.mulf %4, %4 : vector<8x1xf32>
    %11 = arith.subf %9, %10 : vector<8x1xf32>
    %cst_4 = arith.constant 0.000000e+00 : f32
    %12 = vector.broadcast %cst_4 : f32 to vector<8x1xf32>
    %13 = arith.maximumf %11, %12 : vector<8x1xf32>
    %14 = vector.broadcast %4 : vector<8x1xf32> to vector<8x32xf32>
    %15 = arith.subf %0, %14 : vector<8x32xf32>
    %cst_5 = arith.constant 9.99999997E-7 : f32
    %16 = vector.broadcast %cst_5 : f32 to vector<8x1xf32>
    %17 = arith.addf %13, %16 : vector<8x1xf32>
    %18 = math.rsqrt %17 : vector<8x1xf32>
    %19 = vector.broadcast %18 : vector<8x1xf32> to vector<8x32xf32>
    %20 = arith.mulf %15, %19 : vector<8x32xf32>
    %21 = arith.truncf %20 : vector<8x32xf32> to vector<8x32xbf16>
    %cst_6 = arith.constant 0.000000e+00 : f32
    %22 = vector.broadcast %cst_6 : f32 to vector<8x32xf32>
    %c0_i32 = arith.constant 0 : i32
    %23 = arith.index_cast %c0_i32 : i32 to index
    %c0_7 = arith.constant 0 : index
    %c0_8 = arith.constant 0 : index
    %24 = vector.load %arg2[%23, %c0_7, %c0_8] : memref<1x32x64xbf16, #tpu.memory_space<vmem>>, vector<1x32x64xbf16>
    %25 = vector.shape_cast %24 : vector<1x32x64xbf16> to vector<32x64xbf16>
    %26 = arith.index_cast %c0_i32 : i32 to index
    %c0_9 = arith.constant 0 : index
    %c0_10 = arith.constant 0 : index
    %27 = vector.load %arg4[%26, %c0_9, %c0_10] : memref<1x32x64xbf16, #tpu.memory_space<vmem>>, vector<1x32x64xbf16>
    %28 = vector.shape_cast %27 : vector<1x32x64xbf16> to vector<32x64xbf16>
    %29 = arith.index_cast %c0_i32 : i32 to index
    %c0_11 = arith.constant 0 : index
    %c0_12 = arith.constant 0 : index
    %30 = vector.load %arg6[%29, %c0_11, %c0_12] : memref<1x64x32xbf16, #tpu.memory_space<vmem>>, vector<1x64x32xbf16>
    %31 = vector.shape_cast %30 : vector<1x64x32xbf16> to vector<64x32xbf16>
    %cst_13 = arith.constant dense<0.000000e+00> : vector<8x64xf32>
    %32 = tpu.matmul %21, %25, %cst_13 {dimension_numbers = #tpu.dot_dimension_numbers<[1], [0], [0], [1], [0, 0, 1, 1], [], []>} : vector<8x32xbf16>, vector<32x64xbf16>, vector<8x64xf32> -> vector<8x64xf32>
    %33 = arith.index_cast %c0_i32 : i32 to index
    %c0_14 = arith.constant 0 : index
    %c0_15 = arith.constant 0 : index
    %34 = vector.load %arg3[%33, %c0_14, %c0_15] : memref<1x1x64xf32, #tpu.memory_space<vmem>>, vector<1x1x64xf32>
    %35 = vector.shape_cast %34 : vector<1x1x64xf32> to vector<1x64xf32>
    %36 = vector.broadcast %35 : vector<1x64xf32> to vector<8x64xf32>
    %37 = arith.addf %32, %36 : vector<8x64xf32>
    %cst_16 = arith.constant dense<0.000000e+00> : vector<8x64xf32>
    %38 = tpu.matmul %21, %28, %cst_16 {dimension_numbers = #tpu.dot_dimension_numbers<[1], [0], [0], [1], [0, 0, 1, 1], [], []>} : vector<8x32xbf16>, vector<32x64xbf16>, vector<8x64xf32> -> vector<8x64xf32>
    %39 = arith.index_cast %c0_i32 : i32 to index
    %c0_17 = arith.constant 0 : index
    %c0_18 = arith.constant 0 : index
    %40 = vector.load %arg5[%39, %c0_17, %c0_18] : memref<1x1x64xf32, #tpu.memory_space<vmem>>, vector<1x1x64xf32>
    %41 = vector.shape_cast %40 : vector<1x1x64xf32> to vector<1x64xf32>
    %42 = vector.broadcast %41 : vector<1x64xf32> to vector<8x64xf32>
    %43 = arith.addf %38, %42 : vector<8x64xf32>
    %cst_19 = arith.constant 5.000000e-01 : f32
    %44 = vector.broadcast %cst_19 : f32 to vector<8x64xf32>
    %45 = arith.mulf %44, %37 : vector<8x64xf32>
    %cst_20 = arith.constant 0.707106769 : f32
    %46 = vector.broadcast %cst_20 : f32 to vector<8x64xf32>
    %47 = arith.mulf %37, %46 : vector<8x64xf32>
    %cst_21 = arith.constant 0.000000e+00 : f32
    %48 = vector.broadcast %cst_21 : f32 to vector<8x64xf32>
    %49 = arith.cmpf olt, %47, %48 : vector<8x64xf32>
    %cst_22 = arith.constant -1.000000e+00 : f32
    %cst_23 = arith.constant 1.000000e+00 : f32
    %50 = vector.broadcast %cst_22 : f32 to vector<8x64xf32>
    %51 = vector.broadcast %cst_23 : f32 to vector<8x64xf32>
    %52 = arith.select %49, %50, %51 : vector<8x64xi1>, vector<8x64xf32>
    %53 = math.absf %47 : vector<8x64xf32>
    %cst_24 = arith.constant 0.327591091 : f32
    %54 = vector.broadcast %cst_24 : f32 to vector<8x64xf32>
    %55 = arith.mulf %54, %53 : vector<8x64xf32>
    %cst_25 = arith.constant 1.000000e+00 : f32
    %56 = vector.broadcast %cst_25 : f32 to vector<8x64xf32>
    %57 = arith.addf %56, %55 : vector<8x64xf32>
    %58 = tpu.reciprocal %57 {approx = true} : vector<8x64xf32> -> vector<8x64xf32>
    %cst_26 = arith.constant 1.06140542 : f32
    %59 = vector.broadcast %cst_26 : f32 to vector<8x64xf32>
    %60 = arith.mulf %59, %58 : vector<8x64xf32>
    %cst_27 = arith.constant -1.45315206 : f32
    %61 = vector.broadcast %cst_27 : f32 to vector<8x64xf32>
    %62 = arith.addf %60, %61 : vector<8x64xf32>
    %63 = arith.mulf %62, %58 : vector<8x64xf32>
    %cst_28 = arith.constant 1.42141378 : f32
    %64 = vector.broadcast %cst_28 : f32 to vector<8x64xf32>
    %65 = arith.addf %63, %64 : vector<8x64xf32>
    %66 = arith.mulf %65, %58 : vector<8x64xf32>
    %cst_29 = arith.constant -0.284496725 : f32
    %67 = vector.broadcast %cst_29 : f32 to vector<8x64xf32>
    %68 = arith.addf %66, %67 : vector<8x64xf32>
    %69 = arith.mulf %68, %58 : vector<8x64xf32>
    %cst_30 = arith.constant 0.254829586 : f32
    %70 = vector.broadcast %cst_30 : f32 to vector<8x64xf32>
    %71 = arith.addf %69, %70 : vector<8x64xf32>
    %72 = arith.mulf %71, %58 : vector<8x64xf32>
    %cst_31 = arith.constant 0.000000e+00 : f32
    %73 = vector.broadcast %cst_31 : f32 to vector<8x64xf32>
    %74 = arith.subf %73, %53 : vector<8x64xf32>
    %75 = arith.mulf %74, %53 : vector<8x64xf32>
    %76 = math.exp %75 : vector<8x64xf32>
    %77 = arith.mulf %72, %76 : vector<8x64xf32>
    %cst_32 = arith.constant 1.000000e+00 : f32
    %78 = vector.broadcast %cst_32 : f32 to vector<8x64xf32>
    %79 = arith.subf %78, %77 : vector<8x64xf32>
    %80 = arith.mulf %52, %79 : vector<8x64xf32>
    %cst_33 = arith.constant 1.000000e+00 : f32
    %81 = vector.broadcast %cst_33 : f32 to vector<8x64xf32>
    %82 = arith.addf %81, %80 : vector<8x64xf32>
    %83 = arith.mulf %45, %82 : vector<8x64xf32>
    %84 = arith.mulf %83, %43 : vector<8x64xf32>
    %85 = arith.truncf %84 : vector<8x64xf32> to vector<8x64xbf16>
    %cst_34 = arith.constant dense<0.000000e+00> : vector<8x32xf32>
    %86 = tpu.matmul %85, %31, %cst_34 {dimension_numbers = #tpu.dot_dimension_numbers<[1], [0], [0], [1], [0, 0, 1, 1], [], []>} : vector<8x64xbf16>, vector<64x32xbf16>, vector<8x32xf32> -> vector<8x32xf32>
    %87 = arith.addf %22, %86 : vector<8x32xf32>
    %c1_i32 = arith.constant 1 : i32
    %c0_35 = arith.constant 0 : index
    %c0_36 = arith.constant 0 : index
    %88 = vector.load %arg7[%c0_35, %c0_36] : memref<1x32xf32, #tpu.memory_space<vmem>>, vector<1x32xf32>
    %89 = vector.broadcast %88 : vector<1x32xf32> to vector<8x32xf32>
    %90 = arith.addf %87, %89 : vector<8x32xf32>
    %c0_37 = arith.constant 0 : index
    %c0_38 = arith.constant 0 : index
    %91 = vector.load %arg8[%c0_37, %c0_38] : memref<8x32xf32, #tpu.memory_space<vmem>>, vector<8x32xf32>
    tpu.vector_store %arg8[%c0_37, %c0_38], %90 {strides = array<i32>} : memref<8x32xf32, #tpu.memory_space<vmem>>, vector<8x32xf32>,
    return
  }
  func.func @transform_0(%arg0: i32) -> (i32, i32) {
    %c0_i32 = arith.constant 0 : i32
    %c0_i32_0 = arith.constant 0 : i32
    return %arg0, %c0_i32 : i32, i32
  }
  func.func @transform_1(%arg0: i32) -> (i32, i32, i32) {
    %c0_i32 = arith.constant 0 : i32
    %c0_i32_0 = arith.constant 0 : i32
    %c0_i32_1 = arith.constant 0 : i32
    %c0_i32_2 = arith.constant 0 : i32
    return %c0_i32, %c0_i32_0, %c0_i32_1 : i32, i32, i32
  }
  func.func @transform_2(%arg0: i32) -> (i32, i32, i32) {
    %c0_i32 = arith.constant 0 : i32
    %c0_i32_0 = arith.constant 0 : i32
    %c0_i32_1 = arith.constant 0 : i32
    %c0_i32_2 = arith.constant 0 : i32
    return %c0_i32, %c0_i32_0, %c0_i32_1 : i32, i32, i32
  }
  func.func @transform_3(%arg0: i32) -> (i32, i32, i32) {
    %c0_i32 = arith.constant 0 : i32
    %c0_i32_0 = arith.constant 0 : i32
    %c0_i32_1 = arith.constant 0 : i32
    %c0_i32_2 = arith.constant 0 : i32
    return %c0_i32, %c0_i32_0, %c0_i32_1 : i32, i32, i32
  }
  func.func @transform_4(%arg0: i32) -> (i32, i32, i32) {
    %c0_i32 = arith.constant 0 : i32
    %c0_i32_0 = arith.constant 0 : i32
    %c0_i32_1 = arith.constant 0 : i32
    %c0_i32_2 = arith.constant 0 : i32
    return %c0_i32, %c0_i32_0, %c0_i32_1 : i32, i32, i32
  }
  func.func @transform_5(%arg0: i32) -> (i32, i32, i32) {
    %c0_i32 = arith.constant 0 : i32
    %c0_i32_0 = arith.constant 0 : i32
    %c0_i32_1 = arith.constant 0 : i32
    %c0_i32_2 = arith.constant 0 : i32
    return %c0_i32, %c0_i32_0, %c0_i32_1 : i32, i32, i32
  }
  func.func @transform_6(%arg0: i32) -> (i32, i32) {
    %c0_i32 = arith.constant 0 : i32
    %c0_i32_0 = arith.constant 0 : i32
    %c0_i32_1 = arith.constant 0 : i32
    return %c0_i32, %c0_i32_0 : i32, i32
  }
  func.func @transform_7(%arg0: i32) -> (i32, i32) {
    %c0_i32 = arith.constant 0 : i32
    %c0_i32_0 = arith.constant 0 : i32
    return %arg0, %c0_i32 : i32, i32
  }
}

module attributes {stable_mosaic.version = 11 : i64} {
  func.func @_geglu_kernel(%arg0: i32, %arg1: memref<8x32xf32, #tpu.memory_space<vmem>>, %arg2: memref<1x32x64xbf16, #tpu.memory_space<vmem>>, %arg3: memref<1x1x64xf32, #tpu.memory_space<vmem>>, %arg4: memref<1x32x64xbf16, #tpu.memory_space<vmem>>, %arg5: memref<1x1x64xf32, #tpu.memory_space<vmem>>, %arg6: memref<1x64x32xbf16, #tpu.memory_space<vmem>>, %arg7: memref<1x32xf32, #tpu.memory_space<vmem>>, %arg8: memref<8x32xf32, #tpu.memory_space<vmem>>) attributes {dimension_semantics = [#tpu.dimension_semantics<parallel>], iteration_bounds = array<i64: 4>, scalar_prefetch = 0 : i64, scratch_operands = 0 : i64, tpu.core_type = #tpu.core_type<tc>, window_params = [{transform_indices = @transform_0, window_bounds = array<i64: 8, 32>}, {pipeline_mode = #tpu.pipeline_mode<synchronous>, transform_indices = @transform_1, window_bounds = array<i64: 1, 32, 64>}, {pipeline_mode = #tpu.pipeline_mode<synchronous>, transform_indices = @transform_2, window_bounds = array<i64: 1, 1, 64>}, {pipeline_mode = #tpu.pipeline_mode<synchronous>, transform_indices = @transform_3, window_bounds = array<i64: 1, 32, 64>}, {pipeline_mode = #tpu.pipeline_mode<synchronous>, transform_indices = @transform_4, window_bounds = array<i64: 1, 1, 64>}, {pipeline_mode = #tpu.pipeline_mode<synchronous>, transform_indices = @transform_5, window_bounds = array<i64: 1, 64, 32>}, {pipeline_mode = #tpu.pipeline_mode<synchronous>, transform_indices = @transform_6, window_bounds = array<i64: 1, 32>}, {transform_indices = @transform_7, window_bounds = array<i64: 8, 32>}]} {
    %c0 = arith.constant 0 : index
    %c0_0 = arith.constant 0 : index
    %0 = vector.load %arg1[%c0, %c0_0] : memref<8x32xf32, #tpu.memory_space<vmem>>, vector<8x32xf32>
    %cst = arith.constant dense<0.000000e+00> : vector<8xf32>
    %1 = vector.multi_reduction <add>, %0, %cst [1] : vector<8x32xf32> to vector<8xf32>
    %2 = vector.shape_cast %1 : vector<8xf32> to vector<8x1xf32>
    %cst_1 = arith.constant 3.200000e+01 : f32
    %3 = vector.broadcast %cst_1 : f32 to vector<8x1xf32>
    %4 = arith.divf %2, %3 : vector<8x1xf32>
    %5 = arith.mulf %0, %0 : vector<8x32xf32>
    %cst_2 = arith.constant dense<0.000000e+00> : vector<8xf32>
    %6 = vector.multi_reduction <add>, %5, %cst_2 [1] : vector<8x32xf32> to vector<8xf32>
    %7 = vector.shape_cast %6 : vector<8xf32> to vector<8x1xf32>
    %cst_3 = arith.constant 3.200000e+01 : f32
    %8 = vector.broadcast %cst_3 : f32 to vector<8x1xf32>
    %9 = arith.divf %7, %8 : vector<8x1xf32>
    %10 = arith.mulf %4, %4 : vector<8x1xf32>
    %11 = arith.subf %9, %10 : vector<8x1xf32>
    %cst_4 = arith.constant 0.000000e+00 : f32
    %12 = vector.broadcast %cst_4 : f32 to vector<8x1xf32>
    %13 = arith.maximumf %11, %12 : vector<8x1xf32>
    %14 = vector.broadcast %4 : vector<8x1xf32> to vector<8x32xf32>
    %15 = arith.subf %0, %14 : vector<8x32xf32>
    %cst_5 = arith.constant 9.99999997E-7 : f32
    %16 = vector.broadcast %cst_5 : f32 to vector<8x1xf32>
    %17 = arith.addf %13, %16 : vector<8x1xf32>
    %18 = math.rsqrt %17 : vector<8x1xf32>
    %19 = vector.broadcast %18 : vector<8x1xf32> to vector<8x32xf32>
    %20 = arith.mulf %15, %19 : vector<8x32xf32>
    %21 = arith.truncf %20 : vector<8x32xf32> to vector<8x32xbf16>
    %cst_6 = arith.constant 0.000000e+00 : f32
    %22 = vector.broadcast %cst_6 : f32 to vector<8x32xf32>
    %c0_i32 = arith.constant 0 : i32
    %23 = arith.index_cast %c0_i32 : i32 to index
    %c0_7 = arith.constant 0 : index
    %c0_8 = arith.constant 0 : index
    %24 = vector.load %arg2[%23, %c0_7, %c0_8] : memref<1x32x64xbf16, #tpu.memory_space<vmem>>, vector<1x32x64xbf16>
    %25 = vector.shape_cast %24 : vector<1x32x64xbf16> to vector<32x64xbf16>
    %26 = arith.index_cast %c0_i32 : i32 to index
    %c0_9 = arith.constant 0 : index
    %c0_10 = arith.constant 0 : index
    %27 = vector.load %arg4[%26, %c0_9, %c0_10] : memref<1x32x64xbf16, #tpu.memory_space<vmem>>, vector<1x32x64xbf16>
    %28 = vector.shape_cast %27 : vector<1x32x64xbf16> to vector<32x64xbf16>
    %29 = arith.index_cast %c0_i32 : i32 to index
    %c0_11 = arith.constant 0 : index
    %c0_12 = arith.constant 0 : index
    %30 = vector.load %arg6[%29, %c0_11, %c0_12] : memref<1x64x32xbf16, #tpu.memory_space<vmem>>, vector<1x64x32xbf16>
    %31 = vector.shape_cast %30 : vector<1x64x32xbf16> to vector<64x32xbf16>
    %cst_13 = arith.constant dense<0.000000e+00> : vector<8x64xf32>
    %32 = tpu.matmul %21, %25, %cst_13 {dimension_numbers = #tpu.dot_dimension_numbers<[1], [0], [0], [1], [0, 0, 1, 1], [], []>} : vector<8x32xbf16>, vector<32x64xbf16>, vector<8x64xf32> -> vector<8x64xf32>
    %33 = arith.index_cast %c0_i32 : i32 to index
    %c0_14 = arith.constant 0 : index
    %c0_15 = arith.constant 0 : index
    %34 = vector.load %arg3[%33, %c0_14, %c0_15] : memref<1x1x64xf32, #tpu.memory_space<vmem>>, vector<1x1x64xf32>
    %35 = vector.shape_cast %34 : vector<1x1x64xf32> to vector<1x64xf32>
    %36 = vector.broadcast %35 : vector<1x64xf32> to vector<8x64xf32>
    %37 = arith.addf %32, %36 : vector<8x64xf32>
    %cst_16 = arith.constant dense<0.000000e+00> : vector<8x64xf32>
    %38 = tpu.matmul %21, %28, %cst_16 {dimension_numbers = #tpu.dot_dimension_numbers<[1], [0], [0], [1], [0, 0, 1, 1], [], []>} : vector<8x32xbf16>, vector<32x64xbf16>, vector<8x64xf32> -> vector<8x64xf32>
    %39 = arith.index_cast %c0_i32 : i32 to index
    %c0_17 = arith.constant 0 : index
    %c0_18 = arith.constant 0 : index
    %40 = vector.load %arg5[%39, %c0_17, %c0_18] : memref<1x1x64xf32, #tpu.memory_space<vmem>>, vector<1x1x64xf32>
    %41 = vector.shape_cast %40 : vector<1x1x64xf32> to vector<1x64xf32>
    %42 = vector.broadcast %41 : vector<1x64xf32> to vector<8x64xf32>
    %43 = arith.addf %38, %42 : vector<8x64xf32>
    %cst_19 = arith.constant 5.000000e-01 : f32
    %44 = vector.broadcast %cst_19 : f32 to vector<8x64xf32>
    %45 = arith.mulf %44, %37 : vector<8x64xf32>
    %cst_20 = arith.constant 0.707106769 : f32
    %46 = vector.broadcast %cst_20 : f32 to vector<8x64xf32>
    %47 = arith.mulf %37, %46 : vector<8x64xf32>
    %cst_21 = arith.constant 0.000000e+00 : f32
    %48 = vector.broadcast %cst_21 : f32 to vector<8x64xf32>
    %49 = arith.cmpf olt, %47, %48 : vector<8x64xf32>
    %cst_22 = arith.constant -1.000000e+00 : f32
    %cst_23 = arith.constant 1.000000e+00 : f32
    %50 = vector.broadcast %cst_22 : f32 to vector<8x64xf32>
    %51 = vector.broadcast %cst_23 : f32 to vector<8x64xf32>
    %52 = arith.select %49, %50, %51 : vector<8x64xi1>, vector<8x64xf32>
    %53 = math.absf %47 : vector<8x64xf32>
    %cst_24 = arith.constant 0.327591091 : f32
    %54 = vector.broadcast %cst_24 : f32 to vector<8x64xf32>
    %55 = arith.mulf %54, %53 : vector<8x64xf32>
    %cst_25 = arith.constant 1.000000e+00 : f32
    %56 = vector.broadcast %cst_25 : f32 to vector<8x64xf32>
    %57 = arith.addf %56, %55 : vector<8x64xf32>
    %58 = tpu.reciprocal %57 {approx = true} : vector<8x64xf32> -> vector<8x64xf32>
    %cst_26 = arith.constant 1.06140542 : f32
    %59 = vector.broadcast %cst_26 : f32 to vector<8x64xf32>
    %60 = arith.mulf %59, %58 : vector<8x64xf32>
    %cst_27 = arith.constant -1.45315206 : f32
    %61 = vector.broadcast %cst_27 : f32 to vector<8x64xf32>
    %62 = arith.addf %60, %61 : vector<8x64xf32>
    %63 = arith.mulf %62, %58 : vector<8x64xf32>
    %cst_28 = arith.constant 1.42141378 : f32
    %64 = vector.broadcast %cst_28 : f32 to vector<8x64xf32>
    %65 = arith.addf %63, %64 : vector<8x64xf32>
    %66 = arith.mulf %65, %58 : vector<8x64xf32>
    %cst_29 = arith.constant -0.284496725 : f32
    %67 = vector.broadcast %cst_29 : f32 to vector<8x64xf32>
    %68 = arith.addf %66, %67 : vector<8x64xf32>
    %69 = arith.mulf %68, %58 : vector<8x64xf32>
    %cst_30 = arith.constant 0.254829586 : f32
    %70 = vector.broadcast %cst_30 : f32 to vector<8x64xf32>
    %71 = arith.addf %69, %70 : vector<8x64xf32>
    %72 = arith.mulf %71, %58 : vector<8x64xf32>
    %cst_31 = arith.constant 0.000000e+00 : f32
    %73 = vector.broadcast %cst_31 : f32 to vector<8x64xf32>
    %74 = arith.subf %73, %53 : vector<8x64xf32>
    %75 = arith.mulf %74, %53 : vector<8x64xf32>
    %76 = math.exp %75 : vector<8x64xf32>
    %77 = arith.mulf %72, %76 : vector<8x64xf32>
    %cst_32 = arith.constant 1.000000e+00 : f32
    %78 = vector.broadcast %cst_32 : f32 to vector<8x64xf32>
    %79 = arith.subf %78, %77 : vector<8x64xf32>
    %80 = arith.mulf %52, %79 : vector<8x64xf32>
    %cst_33 = arith.constant 1.000000e+00 : f32
    %81 = vector.broadcast %cst_33 : f32 to vector<8x64xf32>
    %82 = arith.addf %81, %80 : vector<8x64xf32>
    %83 = arith.mulf %45, %82 : vector<8x64xf32>
    %84 = arith.mulf %83, %43 : vector<8x64xf32>
    %85 = arith.truncf %84 : vector<8x64xf32> to vector<8x64xbf16>
    %cst_34 = arith.constant dense<0.000000e+00> : vector<8x32xf32>
    %86 = tpu.matmul %85, %31, %cst_34 {dimension_numbers = #tpu.dot_dimension_numbers<[1], [0], [0], [1], [0, 0, 1, 1], [], []>} : vector<8x64xbf16>, vector<64x32xbf16>, vector<8x32xf32> -> vector<8x32xf32>
    %87 = arith.addf %22, %86 : vector<8x32xf32>
    %c1_i32 = arith.constant 1 : i32
    %c0_35 = arith.constant 0 : index
    %c0_36 = arith.constant 0 : index
    %88 = vector.load %arg7[%c0_35, %c0_36] : memref<1x32xf32, #tpu.memory_space<vmem>>, vector<1x32xf32>
    %89 = vector.broadcast %88 : vector<1x32xf32> to vector<8x32xf32>
    %90 = arith.addf %87, %89 : vector<8x32xf32>
    %c0_37 = arith.constant 0 : index
    %c0_38 = arith.constant 0 : index
    %91 = vector.load %arg8[%c0_37, %c0_38] : memref<8x32xf32, #tpu.memory_space<vmem>>, vector<8x32xf32>
    tpu.vector_store %arg8[%c0_37, %c0_38], %90 {strides = array<i32>} : memref<8x32xf32, #tpu.memory_space<vmem>>, vector<8x32xf32>,
    return
  }
  func.func @transform_0(%arg0: i32) -> (i32, i32) {
    %c0_i32 = arith.constant 0 : i32
    %c0_i32_0 = arith.constant 0 : i32
    return %arg0, %c0_i32 : i32, i32
  }
  func.func @transform_1(%arg0: i32) -> (i32, i32, i32) {
    %c0_i32 = arith.constant 0 : i32
    %c0_i32_0 = arith.constant 0 : i32
    %c0_i32_1 = arith.constant 0 : i32
    %c0_i32_2 = arith.constant 0 : i32
    return %c0_i32, %c0_i32_0, %c0_i32_1 : i32, i32, i32
  }
  func.func @transform_2(%arg0: i32) -> (i32, i32, i32) {
    %c0_i32 = arith.constant 0 : i32
    %c0_i32_0 = arith.constant 0 : i32
    %c0_i32_1 = arith.constant 0 : i32
    %c0_i32_2 = arith.constant 0 : i32
    return %c0_i32, %c0_i32_0, %c0_i32_1 : i32, i32, i32
  }
  func.func @transform_3(%arg0: i32) -> (i32, i32, i32) {
    %c0_i32 = arith.constant 0 : i32
    %c0_i32_0 = arith.constant 0 : i32
    %c0_i32_1 = arith.constant 0 : i32
    %c0_i32_2 = arith.constant 0 : i32
    return %c0_i32, %c0_i32_0, %c0_i32_1 : i32, i32, i32
  }
  func.func @transform_4(%arg0: i32) -> (i32, i32, i32) {
    %c0_i32 = arith.constant 0 : i32
    %c0_i32_0 = arith.constant 0 : i32
    %c0_i32_1 = arith.constant 0 : i32
    %c0_i32_2 = arith.constant 0 : i32
    return %c0_i32, %c0_i32_0, %c0_i32_1 : i32, i32, i32
  }
  func.func @transform_5(%arg0: i32) -> (i32, i32, i32) {
    %c0_i32 = arith.constant 0 : i32
    %c0_i32_0 = arith.constant 0 : i32
    %c0_i32_1 = arith.constant 0 : i32
    %c0_i32_2 = arith.constant 0 : i32
    return %c0_i32, %c0_i32_0, %c0_i32_1 : i32, i32, i32
  }
  func.func @transform_6(%arg0: i32) -> (i32, i32) {
    %c0_i32 = arith.constant 0 : i32
    %c0_i32_0 = arith.constant 0 : i32
    %c0_i32_1 = arith.constant 0 : i32
    return %c0_i32, %c0_i32_0 : i32, i32
  }
  func.func @transform_7(%arg0: i32) -> (i32, i32) {
    %c0_i32 = arith.constant 0 : i32
    %c0_i32_0 = arith.constant 0 : i32
    return %arg0, %c0_i32 : i32, i32
  }
}

</mosaic_0001>

<bundles_post_ra>
// kernel: tpu_custom_call.1
= control target key start
LH: loop header
LB: loop body
LE: loop exit
PB: predicated region body
PF: predicated region fallthrough
CT: control target
= control target key end

     0   :  { %12 = vsyncpa [#allocation3], 0  ;;  %s1061_s0 = inlined_call_operand.vmem [shape: f32[32,32], index: 0, kind: input, shape index: {}]   ;;  %s1062_s1 = inlined_call_operand.vmem [shape: bf16[1,32,64], index: 1, kind: input, shape index: {}]   ;;  %s1063_s2 = inlined_call_operand.vmem [shape: f32[1,1,64], index: 2, kind: input, shape index: {}]   ;;  %s1064_s3 = inlined_call_operand.hbm [shape: bf16[1,32,64], index: 3, kind: input, shape index: {}]   ;;  %s1065_s4 = inlined_call_operand.vmem [shape: f32[1,1,64], index: 4, kind: input, shape index: {}]   ;;  %s1066_s5 = inlined_call_operand.vmem [shape: bf16[1,64,32], index: 5, kind: input, shape index: {}]   ;;  %s1067_s6 = inlined_call_operand.vmem [shape: f32[1,32], index: 6, kind: input, shape index: {}]   ;;  %s1068_s7 = inlined_call_operand.hbm [shape: f32[32,32], index: 7, kind: output, shape index: {}]  }
   0x1   :  { %13 = vsyncpa [#allocation4], 0 }
   0x2   :  { %15 = vsyncpa [#allocation4 + $0x1], 0  ;;  %s909_s24 = smov 0   ;;  %s911_s25 = smov 0  }
   0x3   :  { %s913_s26 = smov 0   ;;  %s915_s27 = smov 0  }
   0x4 LB: > { %s930_s28 = sadd.s32 4294967295, %s860_s27   ;;  %s636_s29 = sadd.s32 4294967294, %s860_s27   ;;  %s860_s27 = sphi %s915_s27, %s1076_s27   ;;  %s856_s26 = sphi %s913_s26, %s1075_s26   ;;  %s852_s25 = sphi %s911_s25, %s1074_s25   ;;  %s848_s24 = sphi %s909_s24, %s1073_s24  }
   0x5   : > { %s934_s30 = sadd.s32 1, %s860_s27   ;;  %s180_s8 = sadd.s32 1, %s856_s26 }
   0x6   : > { %s177_s9 = ssub.s32 %s860_s27, %s934_s30  ;;  %p190_p0 = scmp.ne.s32.totalorder %s856_s26, %s852_s25 }
   0x7   : > { %p178_p1 = scmp.eq.s32.totalorder %s177_s9, 0  ;;  %p191_p2 = scmp.eq.s32.totalorder %s930_s28, 3 }
   0x8   : > { %p196_p3 = scmp.ne.s32.totalorder %s852_s25, %s848_s24  ;;  %p197_p4 = scmp.eq.s32.totalorder %s636_s29, 3 }
   0x9   : > { %s945_s10 = scalar_select %p178_p1, %s856_s26, %s180_s8  }
   0xa   : > { %p947_p5 = por %p191_p2, %p190_p0  ;;  %p951_p6 = por %p197_p4, %p196_p3 }
   0xb   : > { %p637_p7 = scmp.ge.s32.totalorder %s860_s27, 1  ;;  %p204_p8 = scmp.lt.s32.totalorder %s860_s27, 5 }
   0xc   : > { %s1070_s12 = scalar_select %p951_p6, 1, 0 }
   0xd   : > { %p715_p9 = scmp.eq.s32.totalorder %s930_s28, 0  ;;  %p958_p10 = pnand %p637_p7, %p204_p8 }
   0xe   : > { %s862_s14 = smov [#allocation2]  }
   0xf   : > { %s222_s15 = sshll.u32 %s862_s14, 4  ;;  %p707_p11 = pneg %p958_p10  ;;  %s223_s15 = int_to_ptr.vmem [resolvable:$true] %s222_s15 }
  0x10   : > { %s781_s16 = scalar_lea.vmem %s223_s15, 256  ;;  %p789_p3 = scmp.lt.s32.totalorder %s223_s15, %s223_s15 }
  0x11   : > { %p708_p12 = pnand %p715_p9, %p707_p11  ;;  %p782_p0 = scmp.ne.s32.totalorder %s223_s15, %s781_s16 }
  0x12   : > { %p790_p4 = scmp.lt.s32.totalorder %s781_s16, %s781_s16 }
  0x13   : > { %p772_p13 = pneg %p708_p12 }
  0x14   : > { %p791_p6 = por %p790_p4, %p789_p3 }
  0x15   : > { %p784_p1 = pnand %p782_p0, %p772_p13 }
  0x17   : > { %p785_p2 = pneg %p784_p1 }
  0x19   : > { %p792_p7 = pnand %p791_p6, %p785_p2 }
  0x1b   : > { %795 = shalt.err (!%p792_p7)
}
  0x1c   : > { %s863_s17 = smov 64   ;;  %s864_s18 = smov 4  }
  0x1d   : > { %710 = dma.hbm_to_vmem [thread:$0]  (!%p708_p12), %s1064_s3, 256, %s223_s15, [#allocation3], %s863_s17, %s863_s17, %s864_s18  }
  0x1e   : > { %254 = sbr.rel (%p958_p10) target bundleno = 670 (0x29e), region = 48 }
  0x23   : > { %839 = dma.done.wait (%p715_p9), [#allocation3], 256  }
  0x24   : > { %841 = vsyncadd (%p715_p9), [#allocation3], 4294967040  ;;  %p285_p8 = scmp.lt.s32.totalorder %s930_s28, 3  ;;  %vm291_vm0 = vcmask 261120   ;;  %v756_v4 = vld [vmem:[%s1062_s1 + $0x8] sm:$0xff]   ;;  %v865_v5 = vmov 0.0  }
  0x25   : > { %673 = vmatprep.subr.bf16.mxu1 %v865_v5  ;;  %vm866_vm1 = vmmov 0   ;;  %v757_v6 = vld [vmem:[%s1062_s1] sm:$0xff]   ;;  %689 = vmatprep.subr.bf16.mxu0 %v865_v5  ;;  %v758_v18 = vld [vmem:[#allocation2 + $0x8] sm:$0xff]   ;;  %v760_v21 = vld [vmem:[%s1066_s5 + $0x18] sm:$0xff]   ;;  %v867_v55 = vmov 1.0   ;;  %vm506_vm3 = vcmask 523264  }
  0x26   : > { %s286_s21 = scalar_select %p285_p8, %s930_s28, 3  ;;  %677 = vmatprep.mubr.msk.bf16.mxu1 %vm866_vm1, %v865_v5  ;;  %674 = vmatpush3.bf16.msra.mxu1 %v756_v4  ;;  %v759_v20 = vld [vmem:[#allocation2] sm:$0xff]   ;;  %v761_v22 = vld [vmem:[%s1066_s5 + $0x10] sm:$0xff]   ;;  %v762_v23 = vld [vmem:[%s1066_s5 + $0x8] sm:$0xff]  }
  0x27   : > { %675 = vmatprep.subr.bf16.mxu1 %v865_v5  ;;  %697 = vmatprep.mubr.msk.bf16.mxu0 %vm866_vm1, %v865_v5  ;;  %v763_v24 = vld [vmem:[%s1066_s5] sm:$0xff]   ;;  %s282_s14 = sand.u32 1, %s852_s25   ;;  %s659_s18 = sshll.u32 %s930_s28, 7 }
  0x28   : > { %s643_s22 = sshll.u32 %s286_s21, 3  ;;  %690 = vmatpush3.bf16.msra.mxu0 %v760_v21  ;;  %v644_v25 = vld [vmem:[%s1063_s2] ss:$0 sm:$0xff]  ;;  %s642_s15 = sshll.u32 %s282_s14, 3 }
  0x29   : > { %s288_s8 = scalar_lea.vmem %s1061_s0, %s643_s22  ;;  %691 = vmatprep.subr.bf16.mxu0 %v865_v5  ;;  %v648_v58 = vld [vmem:[%s1065_s4] ss:$0 sm:$0xff]  ;;  %s284_s19 = scalar_lea.vmem [#allocation5], %s642_s15 }
  0x2a   : > { %v290_v0 = vld [vmem:[%s288_s8] sm:$0xff]  ;;  %676 = vmatpush3.bf16.msra.mxu1 %v757_v6  ;;  %s565_s20 = sshll.u32 %s284_s19, 4  ;;  %s1019_s23 = scalar_lea.hbm %s1068_s7, %s659_s18  ;;  %s1021_s20 = int_to_ptr.vmem [resolvable:$true] %s565_s20 }
  0x2b   : > { %v292_v1 = vsel %vm291_vm0, %v290_v0, 0.0  ;;  %v297_v2 = vmul.f32 %v290_v0, %v290_v0  ;;  %681 = vmatprep.subr.bf16.mxu1 %v865_v5  ;;  %s552_s29 = scalar_lea.sflag [#allocation4], %s282_s14  ;;  %s796_s28 = scalar_lea.vmem %s1021_s20, 128 }
  0x2c   : > { %293 = vadd.xlane.f32.xlu0 %v292_v1  ;;  %692 = vmatpush3.bf16.msra.mxu0 %v761_v22  ;;  %v652_v1 = vld [vmem:[%s1067_s6] ss:$0 sm:$0xff]  ;;  %p797_p6 = scmp.ne.s32.totalorder %s1021_s20, %s796_s28  ;;  %s868_s8 = smov [#allocation5]  }
  0x2d   : > { %v298_v3 = vsel %vm291_vm0, %v297_v2, 0.0  ;;  %693 = vmatprep.subr.bf16.mxu0 %v865_v5  ;;  %s800_s9 = sshll.u32 %s868_s8, 4  ;;  %s801_s9 = int_to_ptr.vmem [resolvable:$false] %s800_s9 }
  0x2e   : > { %p798_p9 = pnand %p797_p6, %p947_p5  ;;  %s802_s13 = scalar_lea.vmem %s801_s9, 256 }
  0x2f   : > { %p803_p11 = scmp.lt.s32.totalorder %s1021_s20, %s801_s9  ;;  %p804_p12 = scmp.lt.s32.totalorder %s802_s13, %s796_s28 }
  0x30   : > { %299 = vadd.xlane.f32.xlu0 %v298_v3  ;;  %694 = vmatpush3.bf16.msra.mxu0 %v762_v23  ;;  %p799_p10 = pneg %p798_p9 }
  0x31   : > { %695 = vmatprep.subr.bf16.mxu0 %v865_v5  ;;  %p805_p13 = por %p804_p12, %p803_p11 }
  0x33   : > { %p806_p0 = pnand %p805_p13, %p799_p10 }
  0x34   : > { %696 = vmatpush3.bf16.msra.mxu0 %v763_v24 }
  0xb5   : > { %v294_v7 = vpop.xlane.xlu0 %293 }
  0xb6   : > { %v296_v8 = vmul.f32 0.03125, %v294_v7 }
  0xb8   : > { %v302_v10 = vmul.f32 %v296_v8, %v296_v8  ;;  %v305_v15 = vsub.f32 %v290_v0, %v296_v8 }
  0xb9   : > { %v300_v9 = vpop.xlane.xlu0 %299 }
  0xba   : > { %v301_v11 = vmul.f32 0.03125, %v300_v9 }
  0xbc   : > { %v303_v12 = vsub.f32 %v301_v11, %v302_v10 }
  0xbe   : > { %v304_v13 = vmax.f32 %v303_v12, 0.0 }
  0xc0   : > { %v306_v14 = vadd.f32 1e-06, %v304_v13 }
  0xc2   : > { %764 = vrsqrt.f32 %v306_v14 }
  0xcf   : > { %v765_v16 = vpop.eup %764 }
  0xd0   : > { %v308_v17 = vmul.f32 %v765_v16, %v305_v15 }
  0xd2   : > { %v309_v19 = vpack.c.bf16 %v308_v17, %v308_v17 }
  0xd4   : > { %678 = vmatmul.mubr.msk.bf16.vlgmr.msra.gmra.mxu1 %vm291_vm0, %v309_v19 }
  0xd5   : > { %682 = vmatpush3.bf16.msra.mxu1 %v758_v18  ;;  %685 = vmatprep.mubr.msk.bf16.mxu1 %vm866_vm1, %v865_v5 }
  0xd6   : > { %683 = vmatprep.subr.bf16.mxu1 %v865_v5 }
  0xd9   : > { %684 = vmatpush3.bf16.msra.mxu1 %v759_v20 }
  0xdc   : > { %686 = vmatmul.mubr.msk.bf16.vlgmr.msra.gmra.mxu1 %vm291_vm0, %v309_v19 }
 0x194   : > { %v382_v26 = vpop.f32.mrf.mxu1 }
 0x195   : > { %v383_v27 = vadd.f32 %v644_v25, %v382_v26 }
 0x196   : > { %v679_v28 = vpop.f32.mrf.mxu1 }
 0x197   : > { %v448_v29 = vmul.f32 0.70710677, %v383_v27  ;;  %v447_v59 = vmul.f32 0.5, %v383_v27 }
 0x198   : > { %v385_v30 = vpop.f32.mrf.mxu1 }
 0x199   : > { %v451_v31 = vand.u32 2147483647, %v448_v29  ;;  %vm449_vm2 = vcmp.lt.f32.partialorder %v448_v29, 0.0 }
 0x19a   : > { %v680_v32 = vpop.f32.mrf.mxu1  ;;  %v450_v56 = vsel %vm449_vm2, -1.0, %v867_v55 }
 0x19b   : > { %v452_v33 = vmul.f32 0.3275911, %v451_v31  ;;  %v464_v39 = vsub.f32 0.0, %v451_v31 }
 0x19c   : > { %v441_v34 = vpop.f32.mrf.mxu1 }
 0x19d   : > { %v453_v35 = vadd.f32 1.0, %v452_v33  ;;  %v465_v40 = vmul.f32 %v464_v39, %v451_v31  ;;  %v442_v61 = vadd.f32 %v648_v58, %v441_v34 }
 0x19e   : > { %v687_v36 = vpop.f32.mrf.mxu1 }
 0x19f   : > { %766 = vrcp.f32 %v453_v35  ;;  %v466_v43 = vmul.f32 1.442695, %v465_v40 }
 0x1a0   : > { %v444_v37 = vpop.f32.mrf.mxu1 }
 0x1a1   : > { %768 = vpow2.f32 %v466_v43 }
 0x1a2   : > { %v688_v38 = vpop.f32.mrf.mxu1 }
 0x1ac   : > { %v767_v41 = vpop.eup %766 }
 0x1ad   : > { %v455_v42 = vmul.f32 1.0614054, %v767_v41 }
 0x1ae   : > { %v769_v52 = vpop.eup %768 }
 0x1af   : > { %v456_v44 = vadd.f32 -1.4531521, %v455_v42 }
 0x1b1   : > { %v457_v45 = vmul.f32 %v767_v41, %v456_v44 }
 0x1b3   : > { %v458_v46 = vadd.f32 1.4214138, %v457_v45 }
 0x1b5   : > { %v459_v47 = vmul.f32 %v767_v41, %v458_v46 }
 0x1b7   : > { %v460_v48 = vadd.f32 -0.28449672, %v459_v47 }
 0x1b9   : > { %v461_v49 = vmul.f32 %v767_v41, %v460_v48 }
 0x1bb   : > { %v462_v50 = vadd.f32 0.2548296, %v461_v49 }
 0x1bd   : > { %v463_v51 = vmul.f32 %v767_v41, %v462_v50 }
 0x1bf   : > { %v468_v53 = vmul.f32 %v769_v52, %v463_v51 }
 0x1c1   : > { %v469_v54 = vsub.f32 1.0, %v468_v53 }
 0x1c3   : > { %v470_v57 = vmul.f32 %v469_v54, %v450_v56 }
 0x1c5   : > { %v471_v60 = vadd.f32 1.0, %v470_v57 }
 0x1c7   : > { %v472_v62 = vmul.f32 %v471_v60, %v447_v59 }
 0x1c9   : > { %v473_v63 = vmul.f32 %v472_v62, %v442_v61 }
 0x1cb   : > { %v474_v0 = vpack.c.bf16 %v473_v63, %v473_v63 }
 0x1cd   : > { %698 = vmatmul.mubr.msk.bf16.vlgmr.msra.gmra.mxu0 %vm506_vm3, %v474_v0 }
 0x28d   : > { %v544_v2 = vpop.f32.mrf.mxu0 }
 0x28e   : > { %v545_v3 = vadd.f32 %v652_v1, %v544_v2 }
 0x28f   : > { %v699_v4 = vpop.f32.mrf.mxu0 }
 0x290   : > { %550 = vst.msk [vmem:[%s284_s19] sm:$0xff] %vm291_vm0, %v545_v3 }
 0x291   : > { %v547_v5 = vpop.f32.mrf.mxu0 }
 0x292   : > { %809 = shalt.err (!%p806_p0)
}
 0x293   : > { %s810_s15 = scalar_lea.hbm %s1019_s23, 128  ;;  %s814_s17 = scalar_lea.hbm %s1068_s7, 512 }
 0x294   : > { %p811_p1 = scmp.ne.s32.totalorder %s1019_s23, %s810_s15  ;;  %p815_p4 = scmp.lt.s32.totalorder %s1019_s23, %s1068_s7 }
 0x295   : > { %p816_p7 = scmp.lt.s32.totalorder %s814_s17, %s810_s15 }
 0x296   : > { %p812_p2 = pnand %p811_p1, %p947_p5 }
 0x297   : > { %p817_p8 = por %p816_p7, %p815_p4 }
 0x298   : > { %p813_p3 = pneg %p812_p2 }
 0x29a   : > { %p818_p6 = pnand %p817_p8, %p813_p3 }
 0x29c   : > { %821 = shalt.err (!%p818_p6)
}
 0x29d   : > { %705 = dma.vmem_to_hbm [thread:$0]  (%p947_p5), %s1021_s20, 128, %s1019_s23, %s552_s29   ;;  %v700_v6 = vpop.f32.mrf.mxu0 }
 0x29e PF: > { %p717_p9 = scmp.ge.s32.totalorder %s860_s27, 2  ;;  %s577_s21 = sand.u32 1, %s848_s24  }
 0x29f   : > { %p1072_p10 = scmp.ne.s32.totalorder %s1070_s12, 0  ;;  %s578_s22 = scalar_lea.sflag [#allocation4], %s577_s21 }
 0x2a1   : > { %p712_p11 = pnand %p717_p9, %p1072_p10 }
 0x2a3   : > { %p713_p12 = pneg %p712_p11 }
 0x2a5   : > { %843 = dma.done.wait (%p713_p12), %s578_s22, 128  }
 0x2a6   : > { %845 = vsyncadd (%p713_p12), %s578_s22, 4294967168  ;;  %p18_p13 = scmp.ge.s32.totalorder %s934_s30, 6   ;;  %s1073_s24 = smov %s852_s25 }
 0x2a7   : > { %s1074_s25 = smov %s856_s26  ;;  %s1075_s26 = smov %s945_s10 }
 0x2a8   : > { %s1076_s27 = smov %s934_s30  ;;  %20 = sbr.rel (!%p18_p13) target bundleno = 4 (0x4), region = 88 }
 0x2ad   :  { %583 = vsyncpa [#allocation3], 1 }
 0x2ae   :  { %585 = vsyncpa [#allocation3 + $0x1], 1 }
 0x2af   :  { %586 = vsyncpa [#allocation4], 1 }
 0x2b0   :  { %588 = vsyncpa [#allocation4 + $0x1], 1 }

// kernel: tpu_custom_call.1
= control target key start
LH: loop header
LB: loop body
LE: loop exit
PB: predicated region body
PF: predicated region fallthrough
CT: control target
= control target key end

     0   :  { %12 = vsyncpa [#allocation3], 0  ;;  %s1061_s0 = inlined_call_operand.vmem [shape: f32[32,32], index: 0, kind: input, shape index: {}]   ;;  %s1062_s1 = inlined_call_operand.vmem [shape: bf16[1,32,64], index: 1, kind: input, shape index: {}]   ;;  %s1063_s2 = inlined_call_operand.vmem [shape: f32[1,1,64], index: 2, kind: input, shape index: {}]   ;;  %s1064_s3 = inlined_call_operand.hbm [shape: bf16[1,32,64], index: 3, kind: input, shape index: {}]   ;;  %s1065_s4 = inlined_call_operand.vmem [shape: f32[1,1,64], index: 4, kind: input, shape index: {}]   ;;  %s1066_s5 = inlined_call_operand.vmem [shape: bf16[1,64,32], index: 5, kind: input, shape index: {}]   ;;  %s1067_s6 = inlined_call_operand.vmem [shape: f32[1,32], index: 6, kind: input, shape index: {}]   ;;  %s1068_s7 = inlined_call_operand.hbm [shape: f32[32,32], index: 7, kind: output, shape index: {}]  }
   0x1   :  { %13 = vsyncpa [#allocation4], 0 }
   0x2   :  { %15 = vsyncpa [#allocation4 + $0x1], 0  ;;  %s909_s24 = smov 0   ;;  %s911_s25 = smov 0  }
   0x3   :  { %s913_s26 = smov 0   ;;  %s915_s27 = smov 0  }
   0x4 LB: > { %s930_s28 = sadd.s32 4294967295, %s860_s27   ;;  %s636_s29 = sadd.s32 4294967294, %s860_s27   ;;  %s860_s27 = sphi %s915_s27, %s1076_s27   ;;  %s856_s26 = sphi %s913_s26, %s1075_s26   ;;  %s852_s25 = sphi %s911_s25, %s1074_s25   ;;  %s848_s24 = sphi %s909_s24, %s1073_s24  }
   0x5   : > { %s934_s30 = sadd.s32 1, %s860_s27   ;;  %s180_s8 = sadd.s32 1, %s856_s26 }
   0x6   : > { %s177_s9 = ssub.s32 %s860_s27, %s934_s30  ;;  %p190_p0 = scmp.ne.s32.totalorder %s856_s26, %s852_s25 }
   0x7   : > { %p178_p1 = scmp.eq.s32.totalorder %s177_s9, 0  ;;  %p191_p2 = scmp.eq.s32.totalorder %s930_s28, 3 }
   0x8   : > { %p196_p3 = scmp.ne.s32.totalorder %s852_s25, %s848_s24  ;;  %p197_p4 = scmp.eq.s32.totalorder %s636_s29, 3 }
   0x9   : > { %s945_s10 = scalar_select %p178_p1, %s856_s26, %s180_s8  }
   0xa   : > { %p947_p5 = por %p191_p2, %p190_p0  ;;  %p951_p6 = por %p197_p4, %p196_p3 }
   0xb   : > { %p637_p7 = scmp.ge.s32.totalorder %s860_s27, 1  ;;  %p204_p8 = scmp.lt.s32.totalorder %s860_s27, 5 }
   0xc   : > { %s1070_s12 = scalar_select %p951_p6, 1, 0 }
   0xd   : > { %p715_p9 = scmp.eq.s32.totalorder %s930_s28, 0  ;;  %p958_p10 = pnand %p637_p7, %p204_p8 }
   0xe   : > { %s862_s14 = smov [#allocation2]  }
   0xf   : > { %s222_s15 = sshll.u32 %s862_s14, 4  ;;  %p707_p11 = pneg %p958_p10  ;;  %s223_s15 = int_to_ptr.vmem [resolvable:$true] %s222_s15 }
  0x10   : > { %s781_s16 = scalar_lea.vmem %s223_s15, 256  ;;  %p789_p3 = scmp.lt.s32.totalorder %s223_s15, %s223_s15 }
  0x11   : > { %p708_p12 = pnand %p715_p9, %p707_p11  ;;  %p782_p0 = scmp.ne.s32.totalorder %s223_s15, %s781_s16 }
  0x12   : > { %p790_p4 = scmp.lt.s32.totalorder %s781_s16, %s781_s16 }
  0x13   : > { %p772_p13 = pneg %p708_p12 }
  0x14   : > { %p791_p6 = por %p790_p4, %p789_p3 }
  0x15   : > { %p784_p1 = pnand %p782_p0, %p772_p13 }
  0x17   : > { %p785_p2 = pneg %p784_p1 }
  0x19   : > { %p792_p7 = pnand %p791_p6, %p785_p2 }
  0x1b   : > { %795 = shalt.err (!%p792_p7)
}
  0x1c   : > { %s863_s17 = smov 64   ;;  %s864_s18 = smov 4  }
  0x1d   : > { %710 = dma.hbm_to_vmem [thread:$0]  (!%p708_p12), %s1064_s3, 256, %s223_s15, [#allocation3], %s863_s17, %s863_s17, %s864_s18  }
  0x1e   : > { %254 = sbr.rel (%p958_p10) target bundleno = 670 (0x29e), region = 48 }
  0x23   : > { %839 = dma.done.wait (%p715_p9), [#allocation3], 256  }
  0x24   : > { %841 = vsyncadd (%p715_p9), [#allocation3], 4294967040  ;;  %p285_p8 = scmp.lt.s32.totalorder %s930_s28, 3  ;;  %vm291_vm0 = vcmask 261120   ;;  %v756_v4 = vld [vmem:[%s1062_s1 + $0x8] sm:$0xff]   ;;  %v865_v5 = vmov 0.0  }
  0x25   : > { %673 = vmatprep.subr.bf16.mxu1 %v865_v5  ;;  %vm866_vm1 = vmmov 0   ;;  %v757_v6 = vld [vmem:[%s1062_s1] sm:$0xff]   ;;  %689 = vmatprep.subr.bf16.mxu0 %v865_v5  ;;  %v758_v18 = vld [vmem:[#allocation2 + $0x8] sm:$0xff]   ;;  %v760_v21 = vld [vmem:[%s1066_s5 + $0x18] sm:$0xff]   ;;  %v867_v55 = vmov 1.0   ;;  %vm506_vm3 = vcmask 523264  }
  0x26   : > { %s286_s21 = scalar_select %p285_p8, %s930_s28, 3  ;;  %677 = vmatprep.mubr.msk.bf16.mxu1 %vm866_vm1, %v865_v5  ;;  %674 = vmatpush3.bf16.msra.mxu1 %v756_v4  ;;  %v759_v20 = vld [vmem:[#allocation2] sm:$0xff]   ;;  %v761_v22 = vld [vmem:[%s1066_s5 + $0x10] sm:$0xff]   ;;  %v762_v23 = vld [vmem:[%s1066_s5 + $0x8] sm:$0xff]  }
  0x27   : > { %675 = vmatprep.subr.bf16.mxu1 %v865_v5  ;;  %697 = vmatprep.mubr.msk.bf16.mxu0 %vm866_vm1, %v865_v5  ;;  %v763_v24 = vld [vmem:[%s1066_s5] sm:$0xff]   ;;  %s282_s14 = sand.u32 1, %s852_s25   ;;  %s659_s18 = sshll.u32 %s930_s28, 7 }
  0x28   : > { %s643_s22 = sshll.u32 %s286_s21, 3  ;;  %690 = vmatpush3.bf16.msra.mxu0 %v760_v21  ;;  %v644_v25 = vld [vmem:[%s1063_s2] ss:$0 sm:$0xff]  ;;  %s642_s15 = sshll.u32 %s282_s14, 3 }
  0x29   : > { %s288_s8 = scalar_lea.vmem %s1061_s0, %s643_s22  ;;  %691 = vmatprep.subr.bf16.mxu0 %v865_v5  ;;  %v648_v58 = vld [vmem:[%s1065_s4] ss:$0 sm:$0xff]  ;;  %s284_s19 = scalar_lea.vmem [#allocation5], %s642_s15 }
  0x2a   : > { %v290_v0 = vld [vmem:[%s288_s8] sm:$0xff]  ;;  %676 = vmatpush3.bf16.msra.mxu1 %v757_v6  ;;  %s565_s20 = sshll.u32 %s284_s19, 4  ;;  %s1019_s23 = scalar_lea.hbm %s1068_s7, %s659_s18  ;;  %s1021_s20 = int_to_ptr.vmem [resolvable:$true] %s565_s20 }
  0x2b   : > { %v292_v1 = vsel %vm291_vm0, %v290_v0, 0.0  ;;  %v297_v2 = vmul.f32 %v290_v0, %v290_v0  ;;  %681 = vmatprep.subr.bf16.mxu1 %v865_v5  ;;  %s552_s29 = scalar_lea.sflag [#allocation4], %s282_s14  ;;  %s796_s28 = scalar_lea.vmem %s1021_s20, 128 }
  0x2c   : > { %293 = vadd.xlane.f32.xlu0 %v292_v1  ;;  %692 = vmatpush3.bf16.msra.mxu0 %v761_v22  ;;  %v652_v1 = vld [vmem:[%s1067_s6] ss:$0 sm:$0xff]  ;;  %p797_p6 = scmp.ne.s32.totalorder %s1021_s20, %s796_s28  ;;  %s868_s8 = smov [#allocation5]  }
  0x2d   : > { %v298_v3 = vsel %vm291_vm0, %v297_v2, 0.0  ;;  %693 = vmatprep.subr.bf16.mxu0 %v865_v5  ;;  %s800_s9 = sshll.u32 %s868_s8, 4  ;;  %s801_s9 = int_to_ptr.vmem [resolvable:$false] %s800_s9 }
  0x2e   : > { %p798_p9 = pnand %p797_p6, %p947_p5  ;;  %s802_s13 = scalar_lea.vmem %s801_s9, 256 }
  0x2f   : > { %p803_p11 = scmp.lt.s32.totalorder %s1021_s20, %s801_s9  ;;  %p804_p12 = scmp.lt.s32.totalorder %s802_s13, %s796_s28 }
  0x30   : > { %299 = vadd.xlane.f32.xlu0 %v298_v3  ;;  %694 = vmatpush3.bf16.msra.mxu0 %v762_v23  ;;  %p799_p10 = pneg %p798_p9 }
  0x31   : > { %695 = vmatprep.subr.bf16.mxu0 %v865_v5  ;;  %p805_p13 = por %p804_p12, %p803_p11 }
  0x33   : > { %p806_p0 = pnand %p805_p13, %p799_p10 }
  0x34   : > { %696 = vmatpush3.bf16.msra.mxu0 %v763_v24 }
  0xb5   : > { %v294_v7 = vpop.xlane.xlu0 %293 }
  0xb6   : > { %v296_v8 = vmul.f32 0.03125, %v294_v7 }
  0xb8   : > { %v302_v10 = vmul.f32 %v296_v8, %v296_v8  ;;  %v305_v15 = vsub.f32 %v290_v0, %v296_v8 }
  0xb9   : > { %v300_v9 = vpop.xlane.xlu0 %299 }
  0xba   : > { %v301_v11 = vmul.f32 0.03125, %v300_v9 }
  0xbc   : > { %v303_v12 = vsub.f32 %v301_v11, %v302_v10 }
  0xbe   : > { %v304_v13 = vmax.f32 %v303_v12, 0.0 }
  0xc0   : > { %v306_v14 = vadd.f32 1e-06, %v304_v13 }
  0xc2   : > { %764 = vrsqrt.f32 %v306_v14 }
  0xcf   : > { %v765_v16 = vpop.eup %764 }
  0xd0   : > { %v308_v17 = vmul.f32 %v765_v16, %v305_v15 }
  0xd2   : > { %v309_v19 = vpack.c.bf16 %v308_v17, %v308_v17 }
  0xd4   : > { %678 = vmatmul.mubr.msk.bf16.vlgmr.msra.gmra.mxu1 %vm291_vm0, %v309_v19 }
  0xd5   : > { %682 = vmatpush3.bf16.msra.mxu1 %v758_v18  ;;  %685 = vmatprep.mubr.msk.bf16.mxu1 %vm866_vm1, %v865_v5 }
  0xd6   : > { %683 = vmatprep.subr.bf16.mxu1 %v865_v5 }
  0xd9   : > { %684 = vmatpush3.bf16.msra.mxu1 %v759_v20 }
  0xdc   : > { %686 = vmatmul.mubr.msk.bf16.vlgmr.msra.gmra.mxu1 %vm291_vm0, %v309_v19 }
 0x194   : > { %v382_v26 = vpop.f32.mrf.mxu1 }
 0x195   : > { %v383_v27 = vadd.f32 %v644_v25, %v382_v26 }
 0x196   : > { %v679_v28 = vpop.f32.mrf.mxu1 }
 0x197   : > { %v448_v29 = vmul.f32 0.70710677, %v383_v27  ;;  %v447_v59 = vmul.f32 0.5, %v383_v27 }
 0x198   : > { %v385_v30 = vpop.f32.mrf.mxu1 }
 0x199   : > { %v451_v31 = vand.u32 2147483647, %v448_v29  ;;  %vm449_vm2 = vcmp.lt.f32.partialorder %v448_v29, 0.0 }
 0x19a   : > { %v680_v32 = vpop.f32.mrf.mxu1  ;;  %v450_v56 = vsel %vm449_vm2, -1.0, %v867_v55 }
 0x19b   : > { %v452_v33 = vmul.f32 0.3275911, %v451_v31  ;;  %v464_v39 = vsub.f32 0.0, %v451_v31 }
 0x19c   : > { %v441_v34 = vpop.f32.mrf.mxu1 }
 0x19d   : > { %v453_v35 = vadd.f32 1.0, %v452_v33  ;;  %v465_v40 = vmul.f32 %v464_v39, %v451_v31  ;;  %v442_v61 = vadd.f32 %v648_v58, %v441_v34 }
 0x19e   : > { %v687_v36 = vpop.f32.mrf.mxu1 }
 0x19f   : > { %766 = vrcp.f32 %v453_v35  ;;  %v466_v43 = vmul.f32 1.442695, %v465_v40 }
 0x1a0   : > { %v444_v37 = vpop.f32.mrf.mxu1 }
 0x1a1   : > { %768 = vpow2.f32 %v466_v43 }
 0x1a2   : > { %v688_v38 = vpop.f32.mrf.mxu1 }
 0x1ac   : > { %v767_v41 = vpop.eup %766 }
 0x1ad   : > { %v455_v42 = vmul.f32 1.0614054, %v767_v41 }
 0x1ae   : > { %v769_v52 = vpop.eup %768 }
 0x1af   : > { %v456_v44 = vadd.f32 -1.4531521, %v455_v42 }
 0x1b1   : > { %v457_v45 = vmul.f32 %v767_v41, %v456_v44 }
 0x1b3   : > { %v458_v46 = vadd.f32 1.4214138, %v457_v45 }
 0x1b5   : > { %v459_v47 = vmul.f32 %v767_v41, %v458_v46 }
 0x1b7   : > { %v460_v48 = vadd.f32 -0.28449672, %v459_v47 }
 0x1b9   : > { %v461_v49 = vmul.f32 %v767_v41, %v460_v48 }
 0x1bb   : > { %v462_v50 = vadd.f32 0.2548296, %v461_v49 }
 0x1bd   : > { %v463_v51 = vmul.f32 %v767_v41, %v462_v50 }
 0x1bf   : > { %v468_v53 = vmul.f32 %v769_v52, %v463_v51 }
 0x1c1   : > { %v469_v54 = vsub.f32 1.0, %v468_v53 }
 0x1c3   : > { %v470_v57 = vmul.f32 %v469_v54, %v450_v56 }
 0x1c5   : > { %v471_v60 = vadd.f32 1.0, %v470_v57 }
 0x1c7   : > { %v472_v62 = vmul.f32 %v471_v60, %v447_v59 }
 0x1c9   : > { %v473_v63 = vmul.f32 %v472_v62, %v442_v61 }
 0x1cb   : > { %v474_v0 = vpack.c.bf16 %v473_v63, %v473_v63 }
 0x1cd   : > { %698 = vmatmul.mubr.msk.bf16.vlgmr.msra.gmra.mxu0 %vm506_vm3, %v474_v0 }
 0x28d   : > { %v544_v2 = vpop.f32.mrf.mxu0 }
 0x28e   : > { %v545_v3 = vadd.f32 %v652_v1, %v544_v2 }
 0x28f   : > { %v699_v4 = vpop.f32.mrf.mxu0 }
 0x290   : > { %550 = vst.msk [vmem:[%s284_s19] sm:$0xff] %vm291_vm0, %v545_v3 }
 0x291   : > { %v547_v5 = vpop.f32.mrf.mxu0 }
 0x292   : > { %809 = shalt.err (!%p806_p0)
}
 0x293   : > { %s810_s15 = scalar_lea.hbm %s1019_s23, 128  ;;  %s814_s17 = scalar_lea.hbm %s1068_s7, 512 }
 0x294   : > { %p811_p1 = scmp.ne.s32.totalorder %s1019_s23, %s810_s15  ;;  %p815_p4 = scmp.lt.s32.totalorder %s1019_s23, %s1068_s7 }
 0x295   : > { %p816_p7 = scmp.lt.s32.totalorder %s814_s17, %s810_s15 }
 0x296   : > { %p812_p2 = pnand %p811_p1, %p947_p5 }
 0x297   : > { %p817_p8 = por %p816_p7, %p815_p4 }
 0x298   : > { %p813_p3 = pneg %p812_p2 }
 0x29a   : > { %p818_p6 = pnand %p817_p8, %p813_p3 }
 0x29c   : > { %821 = shalt.err (!%p818_p6)
}
 0x29d   : > { %705 = dma.vmem_to_hbm [thread:$0]  (%p947_p5), %s1021_s20, 128, %s1019_s23, %s552_s29   ;;  %v700_v6 = vpop.f32.mrf.mxu0 }
 0x29e PF: > { %p717_p9 = scmp.ge.s32.totalorder %s860_s27, 2  ;;  %s577_s21 = sand.u32 1, %s848_s24  }
 0x29f   : > { %p1072_p10 = scmp.ne.s32.totalorder %s1070_s12, 0  ;;  %s578_s22 = scalar_lea.sflag [#allocation4], %s577_s21 }
 0x2a1   : > { %p712_p11 = pnand %p717_p9, %p1072_p10 }
 0x2a3   : > { %p713_p12 = pneg %p712_p11 }
 0x2a5   : > { %843 = dma.done.wait (%p713_p12), %s578_s22, 128  }
 0x2a6   : > { %845 = vsyncadd (%p713_p12), %s578_s22, 4294967168  ;;  %p18_p13 = scmp.ge.s32.totalorder %s934_s30, 6   ;;  %s1073_s24 = smov %s852_s25 }
 0x2a7   : > { %s1074_s25 = smov %s856_s26  ;;  %s1075_s26 = smov %s945_s10 }
 0x2a8   : > { %s1076_s27 = smov %s934_s30  ;;  %20 = sbr.rel (!%p18_p13) target bundleno = 4 (0x4), region = 88 }
 0x2ad   :  { %583 = vsyncpa [#allocation3], 1 }
 0x2ae   :  { %585 = vsyncpa [#allocation3 + $0x1], 1 }
 0x2af   :  { %586 = vsyncpa [#allocation4], 1 }
 0x2b0   :  { %588 = vsyncpa [#allocation4 + $0x1], 1 }

</bundles_post_ra>
